<compile_context>
chip_gen: v7x
topology: tpu7x:2x2x1
jax: 0.10.0
libtpu: 0.0.40
codegen_flags: <defaults>
</compile_context>

<pallas_src>
import functools

import numpy as np
import jax
import jax.numpy as jnp
from jax.experimental import pallas as pl
from jax.experimental.pallas import tpu as pltpu


_SMALL_CHANNEL_BYTES = 128 * 1024        # below this per-channel payload -> VMEM-staged path
_VMEM_SLAB_BUDGET = 4 * 1024 * 1024      # per-slab bytes; x4 (in+out double buffers) ~ 16 MiB
_VMEM_LIMIT_BYTES = 32 * 1024 * 1024     # scoped VMEM limit, safe on v5e/v6e/v7x
_TARGET_JOB_BYTES = 2 * 1024 * 1024      # HBM path: aim for ~2 MiB per DMA job
_TARGET_INFLIGHT_BYTES = 16 * 1024 * 1024
_MIN_CONCURRENT_JOBS = 16


# ----------------------------------------------------------------------------
# Kernels
# ----------------------------------------------------------------------------
def _gather_vmem_kernel(x_ref, o_ref, *, perm):
    """x_ref / o_ref: (N, C, hw_tile) slabs in VMEM.

    `perm` is a static tuple, so every copy below is a static-offset sublane
    slice (no dynamic index, no SMEM read); the slab store back to HBM is fully
    lane-dense.
    """
    for dst, src in enumerate(perm):
        o_ref[:, dst, :] = x_ref[:, src, :]


def _permute_hbm_kernel(x_ref, o_ref, sems, *, jobs, ring):
    """Pure HBM->HBM channel permutation, nothing staged in VMEM.

    `jobs` is a static tuple of (src_chan, dst_chan, h_start, h_size); up to
    `ring` copies are kept in flight on a ring of DMA semaphores.  Start and
    wait descriptors are rebuilt from the same static job table, so they are
    guaranteed identical.
    """
    def copy(i):
        src, dst, h0, hs = jobs[i]
        return pltpu.make_async_copy(
            x_ref.at[:, pl.ds(src, 1), pl.ds(h0, hs), :],
            o_ref.at[:, pl.ds(dst, 1), pl.ds(h0, hs), :],
            sems.at[i % ring],
        )

    n = len(jobs)
    # Prologue: fill the semaphore ring (no branches in the hot loop).
    for i in range(min(ring, n)):
        copy(i).start()
    # Steady state: recycle the oldest slot, then immediately start the next copy.
    for i in range(ring, n):
        copy(i - ring).wait()
        copy(i).start()
    # Drain whatever is still in flight.
    for i in range(max(n - ring, 0), n):
        copy(i).wait()


# ----------------------------------------------------------------------------
# Static planning helpers (all-Python, run at trace time)
# ----------------------------------------------------------------------------
def _choose_hw_tile(N, C, HW, itemsize):
    """Largest lane-dense HW tile whose (N, C, tile) slab fits the VMEM budget."""
    if N * C * HW * itemsize <= _VMEM_SLAB_BUDGET:
        return HW                              # whole trailing dim fits
    if HW % 128:
        return None                            # can't tile lane-densely -> HBM path
    cols = _VMEM_SLAB_BUDGET // (N * C * 128 * itemsize)
    if cols < 1:
        return None
    return int(min(cols * 128, HW))


def _plan_hbm_jobs(N, C, H, W, itemsize, perm):
    """Split channels along H into DMA jobs + pick an adaptive semaphore-ring depth."""
    per_chan = N * H * W * itemsize
    chunks_for_size = max(1, per_chan // _TARGET_JOB_BYTES)
    chunks_for_conc = max(1, -(-_MIN_CONCURRENT_JOBS // C))   # ceil(16 / C)
    n_chunks = int(min(H, max(chunks_for_size, chunks_for_conc)))
    h_chunk = -(-H // n_chunks)                                # ceil(H / n_chunks)

    jobs = []
    for dst, src in enumerate(perm):
        h0 = 0
        while h0 < H:
            hs = min(h_chunk, H - h0)
            jobs.append((src, dst, h0, hs))
            h0 += hs

    per_job = N * h_chunk * W * itemsize
    ring = int(np.clip(_TARGET_INFLIGHT_BYTES // max(per_job, 1), 4, 32))
    ring = max(1, min(ring, len(jobs)))
    return tuple(jobs), ring


# ----------------------------------------------------------------------------
# Wrapper
# ----------------------------------------------------------------------------
@functools.partial(jax.jit, static_argnames=("perm", "path"))
def channel_permute(x, perm, path="auto"):
    """Return x[:, perm] for an NCHW tensor via a Pallas TPU kernel.

    `perm` must be a static (hashable) tuple of ints — the permutation is fixed
    per module instance, so it is baked into the compiled kernel.
    """
    N, C, H, W = x.shape
    perm = tuple(int(p) for p in perm)
    assert len(perm) == C, "perm length must equal channel count"
    itemsize = jnp.dtype(x.dtype).itemsize
    cost = pl.CostEstimate(flops=0, transcendentals=0,
                           bytes_accessed=2 * N * C * H * W * itemsize)

    if path == "auto":
        per_chan_bytes = N * H * W * itemsize
        path = ("vmem"
                if (per_chan_bytes < _SMALL_CHANNEL_BYTES
                    and _choose_hw_tile(N, C, H * W, itemsize) is not None)
                else "hbm")

    if path == "vmem":
        HW = H * W
        hw_tile = _choose_hw_tile(N, C, HW, itemsize)
        if hw_tile is None:
            path = "hbm"                       # fall back below
        else:
            # Free bitcast for the default row-major NCHW layout; gives a
            # lane-dense trailing dim (W alone would be lane-sparse).
            x3 = x.reshape(N, C, HW)
            out = pl.pallas_call(
                functools.partial(_gather_vmem_kernel, perm=perm),
                out_shape=jax.ShapeDtypeStruct((N, C, HW), x.dtype),
                grid_spec=pltpu.PrefetchScalarGridSpec(
                    num_scalar_prefetch=0,
                    grid=(pl.cdiv(HW, hw_tile),),
                    in_specs=[pl.BlockSpec((N, C, hw_tile), lambda t: (0, 0, t))],
                    out_specs=pl.BlockSpec((N, C, hw_tile), lambda t: (0, 0, t)),
                ),
                compiler_params=pltpu.CompilerParams(
                    dimension_semantics=("arbitrary",),
                    vmem_limit_bytes=_VMEM_LIMIT_BYTES),
                cost_estimate=cost,
            )(x3)
            return out.reshape(N, C, H, W)

    # HBM -> HBM direct DMA path (large channels): the 4-D array is passed
    # straight through (no wrapper reshape); nothing is staged in VMEM.
    jobs, ring = _plan_hbm_jobs(N, C, H, W, itemsize, perm)
    out = pl.pallas_call(
        functools.partial(_permute_hbm_kernel, jobs=jobs, ring=ring),
        out_shape=jax.ShapeDtypeStruct((N, C, H, W), x.dtype),
        grid_spec=pltpu.PrefetchScalarGridSpec(
            num_scalar_prefetch=0,
            grid=(1,),
            in_specs=[pl.BlockSpec(memory_space=pl.ANY)],    # raw HBM ref
            out_specs=pl.BlockSpec(memory_space=pl.ANY),     # raw HBM ref, written via DMA
            scratch_shapes=[pltpu.SemaphoreType.DMA((ring,))],
        ),
        compiler_params=pltpu.CompilerParams(
            dimension_semantics=("arbitrary",),
            has_side_effects=True),
        cost_estimate=cost,
    )(x)
    return out


# ----------------------------------------------------------------------------
# Module port
# ----------------------------------------------------------------------------
class ParallelPermutePallas:
    """Permutes each input tensor's channels in a random but fixed way
    (JAX/Pallas port of freia_funcs.ParallelPermute)."""

    def __init__(self, dims_in, seed):
        self.n_inputs = len(dims_in)
        self.in_channels = [dims_in[i][0] for i in range(self.n_inputs)]
        np.random.seed(seed)
        self.perm, self.perm_inv = [], []
        for i in range(self.n_inputs):
            p, p_inv = self._get_random_perm(i)
            self.perm.append(p)
            self.perm_inv.append(p_inv)

    def _get_random_perm(self, i):
        perm = np.random.permutation(self.in_channels[i])
        perm_inv = np.zeros_like(perm)
        for j, p in enumerate(perm):
            perm_inv[p] = j
        # Static tuples: the permutation is fixed, so it is baked into the kernel.
        return (tuple(int(v) for v in perm), tuple(int(v) for v in perm_inv))

    def forward(self, x, rev=False):
        # For truly tiny tensors a plain jnp.take would also be fine (both are
        # bandwidth-bound); we keep the Pallas path so the kernel is exercised.
        perms = self.perm if not rev else self.perm_inv
        return [channel_permute(x[i], perms[i]) for i in range(self.n_inputs)]

    def jacobian(self, x, rev=False):
        return [0.0] * self.n_inputs

    def output_dims(self, input_dims):
        return input_dims


if __name__ == "__main__":
    key = jax.random.PRNGKey(0)
    k0, k1, k2 = jax.random.split(key, 3)

    # Two parallel inputs (NCHW), consistent with dims_in = [(C, H, W), ...]
    dims_in = [(4, 16, 16), (8, 16, 16)]
    batch = 2
    x0 = jax.random.normal(k0, (batch,) + dims_in[0], dtype=jnp.float32)
    x1 = jax.random.normal(k1, (batch,) + dims_in[1], dtype=jnp.float32)
    xs = [x0, x1]

    mod = ParallelPermutePallas(dims_in, seed=123)

    # Forward (VMEM-staged gather path for these small channels).
    ys = [jax.block_until_ready(y) for y in mod.forward(xs, rev=False)]
    # Reverse (inverse permutation) should recover the inputs exactly.
    xs_rec = [jax.block_until_ready(x) for x in mod.forward(ys, rev=True)]

    ok = True
    for i in range(len(xs)):
        ref = jnp.take(xs[i], jnp.asarray(mod.perm[i], dtype=jnp.int32), axis=1)
        ok &= bool(jnp.array_equal(ys[i], ref))
        ok &= bool(jnp.array_equal(xs_rec[i], xs[i]))

    # Also explicitly exercise the HBM->HBM direct-DMA path on a larger tensor.
    xb = jax.random.normal(k2, (2, 4, 64, 64), dtype=jnp.float32)
    perm_b = tuple(int(v) for v in np.random.RandomState(0).permutation(4))
    yb = jax.block_until_ready(channel_permute(xb, perm_b, path="hbm"))
    ok &= bool(jnp.array_equal(
        yb, jnp.take(xb, jnp.asarray(perm_b, dtype=jnp.int32), axis=1)))

    if ok:
        print("KERNEL_OK")
    else:
        raise SystemExit("mismatch vs reference")
</pallas_src>

<mosaic_0001>
module attributes {stable_mosaic.version = 11 : i64} {
  func.func @_gather_vmem_kernel(%arg0: i32, %arg1: memref<2x4x256xf32, #tpu.memory_space<vmem>>, %arg2: memref<2x4x256xf32, #tpu.memory_space<vmem>>) attributes {dimension_semantics = [#tpu.dimension_semantics<arbitrary>], iteration_bounds = array<i64: 1>, scalar_prefetch = 0 : i64, scratch_operands = 0 : i64, tpu.core_type = #tpu.core_type<tc>, window_params = [{transform_indices = @transform_0, window_bounds = array<i64: 2, 4, 256>}, {transform_indices = @transform_1, window_bounds = array<i64: 2, 4, 256>}]} {
    %c0 = arith.constant 0 : index
    %c3 = arith.constant 3 : index
    %c0_0 = arith.constant 0 : index
    %0 = vector.load %arg1[%c0, %c3, %c0_0] : memref<2x4x256xf32, #tpu.memory_space<vmem>>, vector<2x1x256xf32>
    %1 = vector.shape_cast %0 : vector<2x1x256xf32> to vector<2x256xf32>
    %c0_1 = arith.constant 0 : index
    %c0_2 = arith.constant 0 : index
    %c0_3 = arith.constant 0 : index
    %2 = vector.load %arg2[%c0_1, %c0_2, %c0_3] : memref<2x4x256xf32, #tpu.memory_space<vmem>>, vector<2x1x256xf32>
    %3 = vector.shape_cast %2 : vector<2x1x256xf32> to vector<2x256xf32>
    %4 = vector.shape_cast %1 : vector<2x256xf32> to vector<2x1x256xf32>
    tpu.vector_store %arg2[%c0_1, %c0_2, %c0_3], %4 {strides = array<i32>} : memref<2x4x256xf32, #tpu.memory_space<vmem>>, vector<2x1x256xf32>,
    %c0_4 = arith.constant 0 : index
    %c0_5 = arith.constant 0 : index
    %c0_6 = arith.constant 0 : index
    %5 = vector.load %arg1[%c0_4, %c0_5, %c0_6] : memref<2x4x256xf32, #tpu.memory_space<vmem>>, vector<2x1x256xf32>
    %6 = vector.shape_cast %5 : vector<2x1x256xf32> to vector<2x256xf32>
    %c0_7 = arith.constant 0 : index
    %c1 = arith.constant 1 : index
    %c0_8 = arith.constant 0 : index
    %7 = vector.load %arg2[%c0_7, %c1, %c0_8] : memref<2x4x256xf32, #tpu.memory_space<vmem>>, vector<2x1x256xf32>
    %8 = vector.shape_cast %7 : vector<2x1x256xf32> to vector<2x256xf32>
    %9 = vector.shape_cast %6 : vector<2x256xf32> to vector<2x1x256xf32>
    tpu.vector_store %arg2[%c0_7, %c1, %c0_8], %9 {strides = array<i32>} : memref<2x4x256xf32, #tpu.memory_space<vmem>>, vector<2x1x256xf32>,
    %c0_9 = arith.constant 0 : index
    %c1_10 = arith.constant 1 : index
    %c0_11 = arith.constant 0 : index
    %10 = vector.load %arg1[%c0_9, %c1_10, %c0_11] : memref<2x4x256xf32, #tpu.memory_space<vmem>>, vector<2x1x256xf32>
    %11 = vector.shape_cast %10 : vector<2x1x256xf32> to vector<2x256xf32>
    %c0_12 = arith.constant 0 : index
    %c2 = arith.constant 2 : index
    %c0_13 = arith.constant 0 : index
    %12 = vector.load %arg2[%c0_12, %c2, %c0_13] : memref<2x4x256xf32, #tpu.memory_space<vmem>>, vector<2x1x256xf32>
    %13 = vector.shape_cast %12 : vector<2x1x256xf32> to vector<2x256xf32>
    %14 = vector.shape_cast %11 : vector<2x256xf32> to vector<2x1x256xf32>
    tpu.vector_store %arg2[%c0_12, %c2, %c0_13], %14 {strides = array<i32>} : memref<2x4x256xf32, #tpu.memory_space<vmem>>, vector<2x1x256xf32>,
    %c0_14 = arith.constant 0 : index
    %c2_15 = arith.constant 2 : index
    %c0_16 = arith.constant 0 : index
    %15 = vector.load %arg1[%c0_14, %c2_15, %c0_16] : memref<2x4x256xf32, #tpu.memory_space<vmem>>, vector<2x1x256xf32>
    %16 = vector.shape_cast %15 : vector<2x1x256xf32> to vector<2x256xf32>
    %c0_17 = arith.constant 0 : index
    %c3_18 = arith.constant 3 : index
    %c0_19 = arith.constant 0 : index
    %17 = vector.load %arg2[%c0_17, %c3_18, %c0_19] : memref<2x4x256xf32, #tpu.memory_space<vmem>>, vector<2x1x256xf32>
    %18 = vector.shape_cast %17 : vector<2x1x256xf32> to vector<2x256xf32>
    %19 = vector.shape_cast %16 : vector<2x256xf32> to vector<2x1x256xf32>
    tpu.vector_store %arg2[%c0_17, %c3_18, %c0_19], %19 {strides = array<i32>} : memref<2x4x256xf32, #tpu.memory_space<vmem>>, vector<2x1x256xf32>,
    return
  }
  func.func @transform_0(%arg0: i32) -> (i32, i32, i32) {
    %c0_i32 = arith.constant 0 : i32
    %c0_i32_0 = arith.constant 0 : i32
    %c0_i32_1 = arith.constant 0 : i32
    return %c0_i32, %c0_i32_0, %arg0 : i32, i32, i32
  }
  func.func @transform_1(%arg0: i32) -> (i32, i32, i32) {
    %c0_i32 = arith.constant 0 : i32
    %c0_i32_0 = arith.constant 0 : i32
    %c0_i32_1 = arith.constant 0 : i32
    return %c0_i32, %c0_i32_0, %arg0 : i32, i32, i32
  }
}

</mosaic_0001>

<bundles_post_ra>
// kernel: channel_permute.1
= control target key start
LH: loop header
LB: loop body
LE: loop exit
PB: predicated region body
PF: predicated region fallthrough
CT: control target
= control target key end

     0   :  { %v12_v0 = vlaneseq  ;;  %s118_s0 = inlined_call_operand.vmem [shape: f32[2,4,256], index: 0, kind: input, shape index: {}]   ;;  %s119_s1 = inlined_call_operand.vmem [shape: f32[2,4,256], index: 1, kind: output, shape index: {}]  }
   0x1   :  { %v46_v1 = vld [vmem:[%s118_s0 + $0x3] ss:$4 sm:$0x3]  ;;  %v47_v2 = vld [vmem:[%s118_s0 + $0xb] ss:$4 sm:$0x3] }
   0x2   :  { %vm14_vm0 = vcmp.lt.s32.totalorder %v12_v0, 256  ;;  %v19_v3 = vld [vmem:[%s118_s0] ss:$4 sm:$0x3] }
   0x3   :  { %16 = vst.msk [vmem:[%s119_s1] ss:$4 sm:$0x3] %vm14_vm0, %v46_v1  ;;  %48 = vst.msk [vmem:[%s119_s1 + $0x8] ss:$4 sm:$0x3] %vm14_vm0, %v47_v2 }
   0x4   :  { %50 = vst.msk [vmem:[%s119_s1 + $0x1] ss:$4 sm:$0x3] %vm14_vm0, %v19_v3  ;;  %v49_v4 = vld [vmem:[%s118_s0 + $0x8] ss:$4 sm:$0x3] }
   0x5   :  { %v52_v5 = vld [vmem:[%s118_s0 + $0x1] ss:$4 sm:$0x3]  ;;  %51 = vst.msk [vmem:[%s119_s1 + $0x9] ss:$4 sm:$0x3] %vm14_vm0, %v49_v4 }
   0x6   :  { %54 = vst.msk [vmem:[%s119_s1 + $0x2] ss:$4 sm:$0x3] %vm14_vm0, %v52_v5  ;;  %v53_v6 = vld [vmem:[%s118_s0 + $0x9] ss:$4 sm:$0x3] }
   0x7   :  { %v56_v7 = vld [vmem:[%s118_s0 + $0x2] ss:$4 sm:$0x3]  ;;  %55 = vst.msk [vmem:[%s119_s1 + $0xa] ss:$4 sm:$0x3] %vm14_vm0, %v53_v6 }
   0x8   :  { %58 = vst.msk [vmem:[%s119_s1 + $0x3] ss:$4 sm:$0x3] %vm14_vm0, %v56_v7  ;;  %v57_v8 = vld [vmem:[%s118_s0 + $0xa] ss:$4 sm:$0x3] }
   0x9   :  { %59 = vst.msk [vmem:[%s119_s1 + $0xb] ss:$4 sm:$0x3] %vm14_vm0, %v57_v8 }

</bundles_post_ra>
